<compile_context>
chip_gen: v6e
topology: v6e:2x2x1
jax: 0.10.0
libtpu: 0.0.40
codegen_flags: <defaults>
</compile_context>

<pallas_src>
import functools

import jax
import jax.numpy as jnp
from jax import lax
from jax.experimental import pallas as pl
from jax.experimental.pallas import tpu as pltpu

# ---------------------------------------------------------------------------
# Tiling / VMEM budgeting constants.
# ---------------------------------------------------------------------------
_VMEM_LIMIT_BYTES = 48 << 20   # explicit scoped-VMEM limit (headroom under v7x's 64 MiB)
_VMEM_BUDGET_BYTES = 40 << 20  # budget per block incl. f32 temporaries + double buffers
_TARGET_BLOCK_BYTES = 6 << 20  # ~6 MiB of I/O per block (amortizes ~0.35 us step cost)
_N_F32_TEMPS = 3               # f32 temporaries per tile: x upcast, x-m, exp(x-m)
_LANE = 128
_SUBLANE = 8


# ---------------------------------------------------------------------------
# Row-resident kernel: each block holds TR complete rows; reduce whole rows.
# ---------------------------------------------------------------------------
def _row_log_softmax_kernel(x_ref, o_ref):
    x = x_ref[...].astype(jnp.float32)
    m = jnp.max(x, axis=-1, keepdims=True)               # per-row max (XLU)
    xm = x - m                                            # single full-tile subtract
    s = jnp.sum(jnp.exp(xm), axis=-1, keepdims=True)      # EUP + XLU
    o_ref[...] = (xm - jnp.log(s)).astype(o_ref.dtype)    # single full-tile subtract


def _choose_rows_per_block(num_rows, row_elems, itemsize):
    """Rows per block for the row-resident kernel, or None when even the minimal
    (8-row) block plus its f32 temporaries exceeds the VMEM budget (-> chunked)."""
    io_row_bytes = row_elems * itemsize
    # in dbuf (2x) + out dbuf (2x) at input width, plus f32 temporaries.
    per_row_vmem = 4 * io_row_bytes + _N_F32_TEMPS * 4 * row_elems

    min_rows = min(num_rows, _SUBLANE)
    if per_row_vmem * min_rows > _VMEM_BUDGET_BYTES:
        return None                                    # fall back to chunked path

    tr_vmem = max(min_rows, _VMEM_BUDGET_BYTES // per_row_vmem)
    tr_target = max(min_rows, _TARGET_BLOCK_BYTES // max(io_row_bytes, 1))
    tr = min(tr_vmem, tr_target)

    if tr >= num_rows:
        if num_rows <= _SUBLANE:
            return num_rows                            # full dim -> always legal block
        # Never emit grid=(1,) when rows > 8: keep >= 2 row-blocks so "parallel"
        # can shard across v7x's two TensorCores and DMA/compute pipelines.
        half = ((num_rows + 1) // 2 + _SUBLANE - 1) // _SUBLANE * _SUBLANE
        return max(_SUBLANE, half)

    return max(_SUBLANE, (tr // _SUBLANE) * _SUBLANE)   # sublane-aligned


# ---------------------------------------------------------------------------
# Column-chunked path (rows too large for VMEM): two passes.
#   Pass 1: online log-sum-exp per row (running max / rescaled sum in scratch).
#   Pass 2: o = x - lse.
# ---------------------------------------------------------------------------
def _lse_chunk_kernel(x_ref, lse_ref, m_sc, s_sc, *, spatial, chunk_cols):
    j = pl.program_id(1)

    @pl.when(j == 0)
    def _():
        m_sc[...] = jnp.full_like(m_sc, -jnp.inf)
        s_sc[...] = jnp.zeros_like(s_sc)

    x = x_ref[...].astype(jnp.float32)
    if spatial % chunk_cols != 0:
        # Mask garbage columns of the partial last chunk with -inf so they
        # contribute exp(-inf)=0 and never affect the running max.
        col = lax.broadcasted_iota(jnp.int32, x.shape, 1) + j * chunk_cols
        x = jnp.where(col < spatial, x, -jnp.inf)

    m_prev = m_sc[...]
    m_new = jnp.maximum(m_prev, jnp.max(x, axis=-1, keepdims=True))
    s_sc[...] = s_sc[...] * jnp.exp(m_prev - m_new) + jnp.sum(
        jnp.exp(x - m_new), axis=-1, keepdims=True)
    m_sc[...] = m_new

    @pl.when(j == pl.num_programs(1) - 1)
    def _():
        lse_ref[...] = m_sc[...] + jnp.log(s_sc[...])


def _finalize_chunk_kernel(x_ref, lse_ref, o_ref):
    o_ref[...] = (x_ref[...].astype(jnp.float32) - lse_ref[...]).astype(o_ref.dtype)


def _log_softmax_rows_chunked(x2, chunk_cols=None):
    rows, spatial = x2.shape
    itemsize = jnp.dtype(x2.dtype).itemsize
    tr = rows if rows < _SUBLANE else _SUBLANE
    if chunk_cols is None:
        # ~4 MiB of input per chunk block, lane-aligned.
        chunk_cols = max(_LANE, (((4 << 20) // (tr * itemsize)) // _LANE) * _LANE)

    row_blocks = pl.cdiv(rows, tr)
    n_chunks = pl.cdiv(spatial, chunk_cols)

    lse = pl.pallas_call(
        functools.partial(_lse_chunk_kernel, spatial=spatial, chunk_cols=chunk_cols),
        out_shape=jax.ShapeDtypeStruct((rows, 1), jnp.float32),
        grid_spec=pltpu.PrefetchScalarGridSpec(
            num_scalar_prefetch=0,
            grid=(row_blocks, n_chunks),
            in_specs=[pl.BlockSpec((tr, chunk_cols), lambda i, j: (i, j))],
            out_specs=pl.BlockSpec((tr, 1), lambda i, j: (i, 0)),
            scratch_shapes=[pltpu.VMEM((tr, 1), jnp.float32),
                            pltpu.VMEM((tr, 1), jnp.float32)],
        ),
        compiler_params=pltpu.CompilerParams(
            dimension_semantics=("parallel", "arbitrary"),
            vmem_limit_bytes=_VMEM_LIMIT_BYTES,
        ),
        cost_estimate=pl.CostEstimate(
            flops=4 * x2.size,
            transcendentals=x2.size + rows,
            bytes_accessed=x2.size * itemsize + rows * 4,
        ),
    )(x2)

    out = pl.pallas_call(
        _finalize_chunk_kernel,
        out_shape=jax.ShapeDtypeStruct((rows, spatial), x2.dtype),
        grid_spec=pltpu.PrefetchScalarGridSpec(
            num_scalar_prefetch=0,
            grid=(row_blocks, n_chunks),
            in_specs=[pl.BlockSpec((tr, chunk_cols), lambda i, j: (i, j)),
                      pl.BlockSpec((tr, 1), lambda i, j: (i, 0))],
            out_specs=pl.BlockSpec((tr, chunk_cols), lambda i, j: (i, j)),
        ),
        compiler_params=pltpu.CompilerParams(
            dimension_semantics=("parallel", "parallel"),
            vmem_limit_bytes=_VMEM_LIMIT_BYTES,
        ),
        cost_estimate=pl.CostEstimate(
            flops=x2.size,
            transcendentals=0,
            bytes_accessed=2 * x2.size * itemsize + rows * 4,
        ),
    )(x2, lse)
    return out


# ---------------------------------------------------------------------------
# Public wrapper (== LogSoftmaxND.forward).
# ---------------------------------------------------------------------------
def log_softmax_nd(x, spatial_dims=2, *, _force_chunked=False, _force_chunk_cols=None):
    """LogSoftmaxND forward.

    spatial_dims=2: x is (B, C, H, W);    log-softmax jointly over (-2, -1).
    spatial_dims=3: x is (B, C, D, H, W); log-softmax jointly over (-3, -2, -1).
    """
    if spatial_dims == 2:
        B, C, H, W = x.shape
        spatial = H * W
    elif spatial_dims == 3:
        B, C, D, H, W = x.shape
        spatial = D * H * W
    else:
        raise ValueError("spatial_dims must be 2 or 3")

    orig_shape = x.shape
    rows = B * C
    x2 = x.reshape(rows, spatial)
    itemsize = jnp.dtype(x.dtype).itemsize

    pad_cols = (-spatial) % _LANE
    sp_padded = spatial + pad_cols

    tr = None if _force_chunked else _choose_rows_per_block(rows, sp_padded, itemsize)

    if tr is None:
        # Rows too large for a row-resident VMEM block: column-chunked two-pass
        # path (online log-sum-exp + finalize).  No wrapper padding needed —
        # partial last chunk is masked in-kernel.
        out2 = _log_softmax_rows_chunked(x2, chunk_cols=_force_chunk_cols)
        return out2.reshape(orig_shape)

    if pad_cols:
        # Keep output stores lane-dense (last dim a multiple of 128).  Pad with
        # -inf: exp(-inf)=0 so the pad never affects max/sum; sliced off below.
        x2 = jnp.pad(x2, ((0, 0), (0, pad_cols)), constant_values=-jnp.inf)

    out2 = pl.pallas_call(
        _row_log_softmax_kernel,
        out_shape=jax.ShapeDtypeStruct((rows, sp_padded), x.dtype),
        grid_spec=pltpu.PrefetchScalarGridSpec(
            num_scalar_prefetch=0,
            grid=(pl.cdiv(rows, tr),),
            in_specs=[pl.BlockSpec((tr, sp_padded), lambda i: (i, 0))],
            out_specs=pl.BlockSpec((tr, sp_padded), lambda i: (i, 0)),
        ),
        compiler_params=pltpu.CompilerParams(
            dimension_semantics=("parallel",),       # row-blocks shard across TCs (v7x)
            vmem_limit_bytes=_VMEM_LIMIT_BYTES,
        ),
        cost_estimate=pl.CostEstimate(
            flops=4 * rows * sp_padded,
            transcendentals=rows * sp_padded + rows,  # one exp/elem + one log/row
            bytes_accessed=2 * rows * sp_padded * itemsize,
        ),
    )(x2)

    if pad_cols:
        out2 = out2[:, :spatial]
    return out2.reshape(orig_shape)


# ---------------------------------------------------------------------------
# Pure-JAX reference + tests.
# ---------------------------------------------------------------------------
def _reference_log_softmax_nd(x, spatial_dims=2):
    axes = (-2, -1) if spatial_dims == 2 else (-3, -2, -1)
    xf = x.astype(jnp.float32)
    m = jnp.max(xf, axis=axes, keepdims=True)
    e = jnp.exp(xf - m)
    s = jnp.sum(e, axis=axes, keepdims=True)
    return xf - m - jnp.log(s)


if __name__ == "__main__":
    keys = jax.random.split(jax.random.PRNGKey(0), 7)

    def check(x, spatial_dims, tol, **kw):
        out = jax.block_until_ready(log_softmax_nd(x, spatial_dims, **kw))
        ref = _reference_log_softmax_nd(x, spatial_dims)
        assert out.shape == x.shape and out.dtype == x.dtype
        diff = jnp.max(jnp.abs(out.astype(jnp.float32) - ref))
        assert jnp.allclose(out.astype(jnp.float32), ref, atol=tol, rtol=tol), (
            f"mismatch (max abs diff {diff}) for shape {x.shape} dtype {x.dtype} kw={kw}")

    # Baseline 2D / 3D / bf16 cases.
    check(jax.random.normal(keys[0], (2, 4, 16, 16), dtype=jnp.float32), 2, 1e-5)
    check(jax.random.normal(keys[1], (2, 4, 4, 8, 8), dtype=jnp.float32), 3, 1e-5)
    check(jax.random.normal(keys[2], (2, 4, 16, 16), dtype=jnp.bfloat16), 2, 2e-2)

    # spatial not a multiple of 128 -> wrapper -inf padding path.
    check(jax.random.normal(keys[3], (2, 4, 7, 7), dtype=jnp.float32), 2, 1e-5)

    # rows > 8 -> >= 2 row-blocks (partial last block) on the "parallel" axis.
    check(jax.random.normal(keys[4], (3, 4, 16, 16), dtype=jnp.float32), 2, 1e-5)

    # Force the column-chunked (online log-sum-exp) path at small scale.
    check(jax.random.normal(keys[5], (2, 4, 16, 16), dtype=jnp.float32), 2, 1e-4,
          _force_chunked=True, _force_chunk_cols=128)
    # Chunked path with a partial (masked) last chunk and rows < 8.
    check(jax.random.normal(keys[6], (1, 2, 13, 17), dtype=jnp.float32), 2, 1e-4,
          _force_chunked=True, _force_chunk_cols=128)

    print("KERNEL_OK")
</pallas_src>

<mosaic_0001>
module attributes {stable_mosaic.version = 11 : i64} {
  func.func @_row_log_softmax_kernel(%arg0: i32, %arg1: memref<8x256xf32, #tpu.memory_space<vmem>>, %arg2: memref<8x256xf32, #tpu.memory_space<vmem>>) attributes {dimension_semantics = [#tpu.dimension_semantics<parallel>], iteration_bounds = array<i64: 1>, scalar_prefetch = 0 : i64, scratch_operands = 0 : i64, tpu.core_type = #tpu.core_type<tc>, window_params = [{transform_indices = @transform_0, window_bounds = array<i64: 8, 256>}, {transform_indices = @transform_1, window_bounds = array<i64: 8, 256>}]} {
    %c0 = arith.constant 0 : index
    %c0_0 = arith.constant 0 : index
    %0 = vector.load %arg1[%c0, %c0_0] : memref<8x256xf32, #tpu.memory_space<vmem>>, vector<8x256xf32>
    %cst = arith.constant dense<0xFF800000> : vector<8xf32>
    %1 = vector.multi_reduction <maximumf>, %0, %cst [1] : vector<8x256xf32> to vector<8xf32>
    %2 = vector.shape_cast %1 : vector<8xf32> to vector<8x1xf32>
    %3 = vector.broadcast %2 : vector<8x1xf32> to vector<8x256xf32>
    %4 = arith.subf %0, %3 : vector<8x256xf32>
    %5 = math.exp %4 : vector<8x256xf32>
    %cst_1 = arith.constant dense<0.000000e+00> : vector<8xf32>
    %6 = vector.multi_reduction <add>, %5, %cst_1 [1] : vector<8x256xf32> to vector<8xf32>
    %7 = vector.shape_cast %6 : vector<8xf32> to vector<8x1xf32>
    %8 = math.log %7 : vector<8x1xf32>
    %9 = vector.broadcast %8 : vector<8x1xf32> to vector<8x256xf32>
    %10 = arith.subf %4, %9 : vector<8x256xf32>
    %c0_2 = arith.constant 0 : index
    %c0_3 = arith.constant 0 : index
    %11 = vector.load %arg2[%c0_2, %c0_3] : memref<8x256xf32, #tpu.memory_space<vmem>>, vector<8x256xf32>
    tpu.vector_store %arg2[%c0_2, %c0_3], %10 {strides = array<i32>} : memref<8x256xf32, #tpu.memory_space<vmem>>, vector<8x256xf32>,
    return
  }
  func.func @transform_0(%arg0: i32) -> (i32, i32) {
    %c0_i32 = arith.constant 0 : i32
    %c0_i32_0 = arith.constant 0 : i32
    return %arg0, %c0_i32 : i32, i32
  }
  func.func @transform_1(%arg0: i32) -> (i32, i32) {
    %c0_i32 = arith.constant 0 : i32
    %c0_i32_0 = arith.constant 0 : i32
    return %arg0, %c0_i32 : i32, i32
  }
}

</mosaic_0001>

<bundles_post_ra>
// kernel: tpu_custom_call.1
= control target key start
LH: loop header
LB: loop body
LE: loop exit
PB: predicated region body
PF: predicated region fallthrough
CT: control target
= control target key end

     0   :  { %6 = vsyncpa [#allocation3], 0  ;;  %s126_s0 = inlined_call_operand.hbm [shape: f32[8,256], index: 0, kind: input, shape index: {}]   ;;  %s127_s1 = inlined_call_operand.hbm [shape: f32[8,256], index: 1, kind: output, shape index: {}]  }
   0x1   :  { %7 = vsyncpa [#allocation4], 0  ;;  %s108_s6 = smov [#allocation2]  }
   0x2   :  { %s14_s7 = sshll.u32 %s108_s6, 4  ;;  %s15_s7 = int_to_ptr.vmem [resolvable:$true] %s14_s7 }
   0x3   :  { %s72_s8 = scalar_lea.vmem %s15_s7, 256  ;;  %p77_p1 = scmp.lt.s32.totalorder %s15_s7, %s15_s7 }
   0x4   :  { %p73_p0 = scmp.ne.s32.totalorder %s15_s7, %s72_s8  ;;  %p78_p2 = scmp.lt.s32.totalorder %s72_s8, %s72_s8 }
   0x6   :  { %p79_p3 = por %p78_p2, %p77_p1 }
   0x8   :  { %p80_p4 = pnand %p79_p3, %p73_p0 }
   0xa   :  { %83 = shalt.err (!%p80_p4)
}
   0xb   :  { %17 = dma.hbm_to_vmem [thread:$0]  %s126_s0, 256, %s15_s7, [#allocation3]  }
   0xc   :  { %104 = dma.done.wait [#allocation3], 256  }
   0xd   :  { %105 = vsyncadd [#allocation3], 4294967040  ;;  %v21_v0 = vld [vmem:[#allocation2] sm:$0xff]  ;;  %v22_v1 = vld [vmem:[#allocation2 + $0x8] sm:$0xff]  ;;  %s109_s0 = smov [#allocation5]  }
   0xe   :  { %v23_v2 = vmax.f32 %v21_v0, %v22_v1  ;;  %s47_s11 = sshll.u32 %s109_s0, 4  ;;  %s48_s11 = int_to_ptr.vmem [resolvable:$true] %s47_s11 }
   0xf   :  { %s84_s12 = scalar_lea.vmem %s48_s11, 256  ;;  %p89_p6 = scmp.lt.s32.totalorder %s48_s11, %s48_s11 }
  0x10   :  { %24 = vmax.xlane.f32.xlu0 %v23_v2  ;;  %p85_p5 = scmp.ne.s32.totalorder %s48_s11, %s84_s12  ;;  %p90_p7 = scmp.lt.s32.totalorder %s84_s12, %s84_s12 }
  0x12   :  { %p91_p8 = por %p90_p7, %p89_p6 }
  0x14   :  { %p92_p9 = pnand %p91_p8, %p85_p5 }
  0x99   :  { %v25_v3 = vpop.xlane.xlu0 %24 }
  0x9a   :  { %v26_v4 = vsub.f32 %v21_v0, %v25_v3  ;;  %v27_v5 = vsub.f32 %v22_v1, %v25_v3 }
  0x9c   :  { %v28_v6 = vmul.f32 1.442695, %v26_v4  ;;  %v30_v7 = vmul.f32 1.442695, %v27_v5 }
  0x9e   :  { %58 = vpow2.f32 %v28_v6 }
  0x9f   :  { %60 = vpow2.f32 %v30_v7 }
  0xab   :  { %v59_v8 = vpop.eup %58 }
  0xac   :  { %v61_v9 = vpop.eup %60 }
  0xad   :  { %v32_v10 = vadd.f32 %v61_v9, %v59_v8 }
  0xaf   :  { %33 = vadd.xlane.f32.xlu0 %v32_v10 }
 0x138   :  { %v34_v11 = vpop.xlane.xlu0 %33 }
 0x139   :  { %62 = vlog2.f32 %v34_v11 }
 0x146   :  { %v63_v12 = vpop.eup %62 }
 0x147   :  { %v36_v13 = vmul.f32 0.6931472, %v63_v12 }
 0x149   :  { %v37_v14 = vsub.f32 %v26_v4, %v36_v13  ;;  %v38_v15 = vsub.f32 %v27_v5, %v36_v13 }
 0x14b   :  { %39 = vst [vmem:[#allocation5] sm:$0xff] %v37_v14  ;;  %40 = vst [vmem:[#allocation5 + $0x8] sm:$0xff] %v38_v15 }
 0x14c   :  { %95 = shalt.err (!%p92_p9)
}
 0x14d   :  { %50 = dma.vmem_to_hbm [thread:$0]  %s48_s11, 256, %s127_s1, [#allocation4]  }
 0x14e   :  { %106 = dma.done.wait [#allocation4], 256  }
 0x14f   :  { %107 = vsyncadd [#allocation4], 4294967040 }
 0x150   :  { %54 = vsyncpa [#allocation3], 1 }
 0x151   :  { %55 = vsyncpa [#allocation4], 1 }

</bundles_post_ra>
